<compile_context>
chip_gen: v7x
topology: tpu7x:2x2x1
jax: 0.10.0
libtpu: 0.0.40
codegen_flags: <defaults>
</compile_context>

<pallas_src>
import math

import jax
import jax.numpy as jnp
from jax.experimental import pallas as pl
from jax.experimental.pallas import tpu as pltpu

MIN_LOG_STD = math.log(1e-6)            # ControllerMonolithic(min_std=1e-6)
HALF_LOG_2PI = 0.5 * math.log(2.0 * math.pi)

_LANE = 128
_SUB = 8


def _pad8(n):
    return ((n + _SUB - 1) // _SUB) * _SUB


# ----------------------------------------------------------------------------
# Parameter packing: one (rows, 128) f32 slab, feature-major weights (out, in),
# biases/sigma as column vectors packed into spare lane columns.  Every tensor
# block starts on an 8-sublane boundary; static slices stay inside (8,128) tiles.
# ----------------------------------------------------------------------------
def pack_params(p, d_in, h, d_out):
    assert d_in <= _LANE and h <= _LANE and d_out <= _LANE, \
        "pack_params assumes every parameter fits in 128 lane columns"
    assert d_in + 3 <= _LANE and h + 2 <= _LANE

    rows = 3 * _pad8(h) + _pad8(d_out)
    slab = jnp.zeros((rows, _LANE), jnp.float32)
    offsets = {}

    def place(slab, name, arr, row, col):
        a = jnp.asarray(arr, jnp.float32)
        if a.ndim == 1:
            a = a.reshape(-1, 1)                    # column vector
        r, c = a.shape
        offsets[name] = (row, col, r, c)
        return slab.at[row:row + r, col:col + c].set(a)

    r0, r1, r2, r3 = 0, _pad8(h), 2 * _pad8(h), 3 * _pad8(h)
    slab = place(slab, "w1", p["w1"], r0, 0)            # (H, D_in)
    slab = place(slab, "b1", p["b1"], r0, d_in)         # (H, 1)
    slab = place(slab, "b2", p["b2"], r0, d_in + 1)     # (H, 1)
    slab = place(slab, "b3", p["b3"], r0, d_in + 2)     # (H, 1)
    slab = place(slab, "w2", p["w2"], r1, 0)            # (H, H)
    slab = place(slab, "w3", p["w3"], r2, 0)            # (H, H)
    slab = place(slab, "w4", p["w4"], r3, 0)            # (D_out, H)
    slab = place(slab, "b4", p["b4"], r3, h)            # (D_out, 1)
    slab = place(slab, "sigma", p["sigma"], r3, h + 1)  # (D_out, 1)
    return slab, offsets


# ----------------------------------------------------------------------------
# Kernel (feature-major: batch on lanes)
# ----------------------------------------------------------------------------
def make_kernel(offsets):
    def kernel(x_ref, e_ref, p_ref, out_ref):
        def slab(name):
            r, c, nr, nc = offsets[name]        # static python ints -> free ref views
            return p_ref[r:r + nr, c:c + nc]

        x = x_ref[...]                          # (D_in, TILE_B)
        eps = e_ref[...]                        # (D_out, TILE_B)

        def layer(wname, bname, v, relu):
            y = jnp.dot(slab(wname), v, preferred_element_type=jnp.float32) + slab(bname)
            return jnp.maximum(y, 0.0) if relu else y

        hdn = layer("w1", "b1", x, True)        # (H, TILE_B)
        hdn = layer("w2", "b2", hdn, True)
        hdn = layer("w3", "b3", hdn, True)
        means = layer("w4", "b4", hdn, False)   # (D_out, TILE_B)

        log_scale = jnp.maximum(slab("sigma"), MIN_LOG_STD)   # (D_out, 1)
        scales = jnp.exp(log_scale)

        # dist.sample() and dist.log_prob(action):
        #   (action - means)/scales == eps exactly; log(scales) == clamped sigma.
        out_ref[0] = means + scales * eps
        out_ref[1] = -0.5 * (eps * eps) - log_scale - HALF_LOG_2PI

    return kernel


# ----------------------------------------------------------------------------
# Wrapper.  Inputs/outputs are feature-major (features, batch) — layout plumbing
# to/from (batch, features) is the caller's choice and stays out of the hot path.
# ----------------------------------------------------------------------------
def controller_monolithic_forward(x_t, eps_t, slab, offsets, dims, *, tile_b=None):
    """x_t: (D_in, B) f32, eps_t: (D_out, B) f32 N(0,1).
    Returns (action (D_out,B), log_prob (D_out,B), None)."""
    d_in, _, d_out = dims
    b = x_t.shape[1]
    if tile_b is None:
        tile_b = b                               # single grid step (v5e/v6e default)
    assert b % tile_b == 0, "batch must be divisible by tile_b"
    assert tile_b == b or tile_b % _LANE == 0, "tile_b must be lane-aligned"

    grid_steps = b // tile_b
    r_slab = slab.shape[0]
    kernel = make_kernel(offsets)

    out = pl.pallas_call(
        kernel,
        out_shape=jax.ShapeDtypeStruct((2, d_out, b), jnp.float32),
        grid_spec=pltpu.PrefetchScalarGridSpec(
            num_scalar_prefetch=0,
            grid=(grid_steps,),
            in_specs=[
                # activations / noise: batch (lanes) pipelined over the grid
                pl.BlockSpec((d_in, tile_b), lambda i: (0, i)),
                pl.BlockSpec((d_out, tile_b), lambda i: (0, i)),
                # packed parameter slab: constant index_map -> resident in VMEM
                pl.BlockSpec((r_slab, _LANE), lambda i: (0, 0)),
            ],
            out_specs=pl.BlockSpec((2, d_out, tile_b), lambda i: (0, 0, i)),
        ),
        compiler_params=pltpu.CompilerParams(
            # megacore split only pays when there are multiple grid steps (large B on v7x)
            dimension_semantics=(("parallel",) if grid_steps > 1 else ("arbitrary",)),
            vmem_limit_bytes=32 * 1024 * 1024,
        ),
    )(x_t, eps_t, slab)

    return out[0], out[1], None


# ----------------------------------------------------------------------------
# Synthetic init (mirrors nn.Linear default U(-1/sqrt(fan_in), 1/sqrt(fan_in)));
# weights stored PyTorch-style (out_features, in_features) for W @ X compute.
# ----------------------------------------------------------------------------
def init_params(key, d_in, h, d_out, init_std=1.0):
    def linear_init(k, fan_in, fan_out):
        kw, kb = jax.random.split(k)
        bound = 1.0 / math.sqrt(fan_in)
        w = jax.random.uniform(kw, (fan_out, fan_in), jnp.float32, -bound, bound)
        b = jax.random.uniform(kb, (fan_out,), jnp.float32, -bound, bound)
        return w, b

    ks = jax.random.split(key, 4)
    w1, b1 = linear_init(ks[0], d_in, h)
    w2, b2 = linear_init(ks[1], h, h)
    w3, b3 = linear_init(ks[2], h, h)
    w4, b4 = linear_init(ks[3], h, d_out)
    sigma = jnp.full((d_out,), math.log(init_std), jnp.float32)
    return dict(w1=w1, b1=b1, w2=w2, b2=b2, w3=w3, b3=b3, w4=w4, b4=b4, sigma=sigma)


def reference_forward(x_t, eps_t, p):
    hp = jax.lax.Precision.HIGHEST
    h = jax.nn.relu(jnp.dot(p["w1"], x_t, precision=hp) + p["b1"][:, None])
    h = jax.nn.relu(jnp.dot(p["w2"], h, precision=hp) + p["b2"][:, None])
    h = jax.nn.relu(jnp.dot(p["w3"], h, precision=hp) + p["b3"][:, None])
    means = jnp.dot(p["w4"], h, precision=hp) + p["b4"][:, None]
    log_scale = jnp.maximum(p["sigma"][:, None], MIN_LOG_STD)
    scales = jnp.exp(log_scale)
    action = means + scales * eps_t
    log_prob = -0.5 * eps_t * eps_t - log_scale - HALF_LOG_2PI
    return action, log_prob


if __name__ == "__main__":
    D_IN, H, D_OUT = 4, 32, 4
    B = 256                          # single grid step; batch on the lane axis

    key = jax.random.PRNGKey(0)
    pkey, xkey, ekey = jax.random.split(key, 3)

    params = init_params(pkey, D_IN, H, D_OUT, init_std=1.0)
    slab, offsets = pack_params(params, D_IN, H, D_OUT)

    x_t = jax.random.normal(xkey, (D_IN, B), jnp.float32)     # feature-major inputs
    eps_t = jax.random.normal(ekey, (D_OUT, B), jnp.float32)

    action, log_prob, _ = controller_monolithic_forward(
        x_t, eps_t, slab, offsets, (D_IN, H, D_OUT))
    jax.block_until_ready((action, log_prob))

    ref_action, ref_log_prob = reference_forward(x_t, eps_t, params)
    assert jnp.allclose(action, ref_action, atol=2e-3, rtol=2e-3)
    assert jnp.allclose(log_prob, ref_log_prob, atol=2e-3, rtol=2e-3)

    print("KERNEL_OK")
</pallas_src>

<mosaic_0001>
module attributes {stable_mosaic.version = 11 : i64} {
  func.func @kernel(%arg0: i32, %arg1: memref<4x256xf32, #tpu.memory_space<vmem>>, %arg2: memref<4x256xf32, #tpu.memory_space<vmem>>, %arg3: memref<104x128xf32, #tpu.memory_space<vmem>>, %arg4: memref<2x4x256xf32, #tpu.memory_space<vmem>>) attributes {dimension_semantics = [#tpu.dimension_semantics<arbitrary>], iteration_bounds = array<i64: 1>, scalar_prefetch = 0 : i64, scratch_operands = 0 : i64, tpu.core_type = #tpu.core_type<tc>, window_params = [{transform_indices = @transform_0, window_bounds = array<i64: 4, 256>}, {transform_indices = @transform_1, window_bounds = array<i64: 4, 256>}, {pipeline_mode = #tpu.pipeline_mode<synchronous>, transform_indices = @transform_2, window_bounds = array<i64: 104, 128>}, {transform_indices = @transform_3, window_bounds = array<i64: 2, 4, 256>}]} {
    %c0 = arith.constant 0 : index
    %c0_0 = arith.constant 0 : index
    %0 = vector.load %arg1[%c0, %c0_0] : memref<4x256xf32, #tpu.memory_space<vmem>>, vector<4x256xf32>
    %c0_1 = arith.constant 0 : index
    %c0_2 = arith.constant 0 : index
    %1 = vector.load %arg2[%c0_1, %c0_2] : memref<4x256xf32, #tpu.memory_space<vmem>>, vector<4x256xf32>
    %c0_3 = arith.constant 0 : index
    %c0_4 = arith.constant 0 : index
    %2 = vector.load %arg3[%c0_3, %c0_4] : memref<104x128xf32, #tpu.memory_space<vmem>>, vector<32x4xf32>
    %cst = arith.constant dense<0.000000e+00> : vector<32x256xf32>
    %3 = tpu.matmul %2, %0, %cst {dimension_numbers = #tpu.dot_dimension_numbers<[1], [0], [0], [1], [0, 0, 1, 1], [], []>} : vector<32x4xf32>, vector<4x256xf32>, vector<32x256xf32> -> vector<32x256xf32>
    %c0_5 = arith.constant 0 : index
    %c4 = arith.constant 4 : index
    %4 = vector.load %arg3[%c0_5, %c4] : memref<104x128xf32, #tpu.memory_space<vmem>>, vector<32x1xf32>
    %5 = vector.broadcast %4 : vector<32x1xf32> to vector<32x256xf32>
    %6 = arith.addf %3, %5 : vector<32x256xf32>
    %cst_6 = arith.constant 0.000000e+00 : f32
    %7 = vector.broadcast %cst_6 : f32 to vector<32x256xf32>
    %8 = arith.maximumf %6, %7 : vector<32x256xf32>
    %c32 = arith.constant 32 : index
    %c0_7 = arith.constant 0 : index
    %9 = vector.load %arg3[%c32, %c0_7] : memref<104x128xf32, #tpu.memory_space<vmem>>, vector<32x32xf32>
    %cst_8 = arith.constant dense<0.000000e+00> : vector<32x256xf32>
    %10 = tpu.matmul %9, %8, %cst_8 {dimension_numbers = #tpu.dot_dimension_numbers<[1], [0], [0], [1], [0, 0, 1, 1], [], []>} : vector<32x32xf32>, vector<32x256xf32>, vector<32x256xf32> -> vector<32x256xf32>
    %c0_9 = arith.constant 0 : index
    %c5 = arith.constant 5 : index
    %11 = vector.load %arg3[%c0_9, %c5] : memref<104x128xf32, #tpu.memory_space<vmem>>, vector<32x1xf32>
    %12 = vector.broadcast %11 : vector<32x1xf32> to vector<32x256xf32>
    %13 = arith.addf %10, %12 : vector<32x256xf32>
    %cst_10 = arith.constant 0.000000e+00 : f32
    %14 = vector.broadcast %cst_10 : f32 to vector<32x256xf32>
    %15 = arith.maximumf %13, %14 : vector<32x256xf32>
    %c64 = arith.constant 64 : index
    %c0_11 = arith.constant 0 : index
    %16 = vector.load %arg3[%c64, %c0_11] : memref<104x128xf32, #tpu.memory_space<vmem>>, vector<32x32xf32>
    %cst_12 = arith.constant dense<0.000000e+00> : vector<32x256xf32>
    %17 = tpu.matmul %16, %15, %cst_12 {dimension_numbers = #tpu.dot_dimension_numbers<[1], [0], [0], [1], [0, 0, 1, 1], [], []>} : vector<32x32xf32>, vector<32x256xf32>, vector<32x256xf32> -> vector<32x256xf32>
    %c0_13 = arith.constant 0 : index
    %c6 = arith.constant 6 : index
    %18 = vector.load %arg3[%c0_13, %c6] : memref<104x128xf32, #tpu.memory_space<vmem>>, vector<32x1xf32>
    %19 = vector.broadcast %18 : vector<32x1xf32> to vector<32x256xf32>
    %20 = arith.addf %17, %19 : vector<32x256xf32>
    %cst_14 = arith.constant 0.000000e+00 : f32
    %21 = vector.broadcast %cst_14 : f32 to vector<32x256xf32>
    %22 = arith.maximumf %20, %21 : vector<32x256xf32>
    %c96 = arith.constant 96 : index
    %c0_15 = arith.constant 0 : index
    %23 = vector.load %arg3[%c96, %c0_15] : memref<104x128xf32, #tpu.memory_space<vmem>>, vector<4x32xf32>
    %cst_16 = arith.constant dense<0.000000e+00> : vector<4x256xf32>
    %24 = tpu.matmul %23, %22, %cst_16 {dimension_numbers = #tpu.dot_dimension_numbers<[1], [0], [0], [1], [0, 0, 1, 1], [], []>} : vector<4x32xf32>, vector<32x256xf32>, vector<4x256xf32> -> vector<4x256xf32>
    %c96_17 = arith.constant 96 : index
    %c32_18 = arith.constant 32 : index
    %25 = vector.load %arg3[%c96_17, %c32_18] : memref<104x128xf32, #tpu.memory_space<vmem>>, vector<4x1xf32>
    %26 = vector.broadcast %25 : vector<4x1xf32> to vector<4x256xf32>
    %27 = arith.addf %24, %26 : vector<4x256xf32>
    %c96_19 = arith.constant 96 : index
    %c33 = arith.constant 33 : index
    %28 = vector.load %arg3[%c96_19, %c33] : memref<104x128xf32, #tpu.memory_space<vmem>>, vector<4x1xf32>
    %cst_20 = arith.constant -13.8155107 : f32
    %29 = vector.broadcast %cst_20 : f32 to vector<4x1xf32>
    %30 = arith.maximumf %28, %29 : vector<4x1xf32>
    %31 = math.exp %30 : vector<4x1xf32>
    %32 = vector.broadcast %31 : vector<4x1xf32> to vector<4x256xf32>
    %33 = arith.mulf %32, %1 : vector<4x256xf32>
    %34 = arith.addf %27, %33 : vector<4x256xf32>
    %c0_21 = arith.constant 0 : index
    %c0_22 = arith.constant 0 : index
    %c0_23 = arith.constant 0 : index
    %35 = vector.load %arg4[%c0_21, %c0_22, %c0_23] : memref<2x4x256xf32, #tpu.memory_space<vmem>>, vector<1x4x256xf32>
    %36 = vector.shape_cast %35 : vector<1x4x256xf32> to vector<4x256xf32>
    %37 = vector.shape_cast %34 : vector<4x256xf32> to vector<1x4x256xf32>
    tpu.vector_store %arg4[%c0_21, %c0_22, %c0_23], %37 {strides = array<i32>} : memref<2x4x256xf32, #tpu.memory_space<vmem>>, vector<1x4x256xf32>,
    %38 = arith.mulf %1, %1 : vector<4x256xf32>
    %cst_24 = arith.constant -5.000000e-01 : f32
    %39 = vector.broadcast %cst_24 : f32 to vector<4x256xf32>
    %40 = arith.mulf %39, %38 : vector<4x256xf32>
    %41 = vector.broadcast %30 : vector<4x1xf32> to vector<4x256xf32>
    %42 = arith.subf %40, %41 : vector<4x256xf32>
    %cst_25 = arith.constant 0.918938517 : f32
    %43 = vector.broadcast %cst_25 : f32 to vector<4x256xf32>
    %44 = arith.subf %42, %43 : vector<4x256xf32>
    %c1 = arith.constant 1 : index
    %c0_26 = arith.constant 0 : index
    %c0_27 = arith.constant 0 : index
    %45 = vector.load %arg4[%c1, %c0_26, %c0_27] : memref<2x4x256xf32, #tpu.memory_space<vmem>>, vector<1x4x256xf32>
    %46 = vector.shape_cast %45 : vector<1x4x256xf32> to vector<4x256xf32>
    %47 = vector.shape_cast %44 : vector<4x256xf32> to vector<1x4x256xf32>
    tpu.vector_store %arg4[%c1, %c0_26, %c0_27], %47 {strides = array<i32>} : memref<2x4x256xf32, #tpu.memory_space<vmem>>, vector<1x4x256xf32>,
    return
  }
  func.func @transform_0(%arg0: i32) -> (i32, i32) {
    %c0_i32 = arith.constant 0 : i32
    %c0_i32_0 = arith.constant 0 : i32
    return %c0_i32, %arg0 : i32, i32
  }
  func.func @transform_1(%arg0: i32) -> (i32, i32) {
    %c0_i32 = arith.constant 0 : i32
    %c0_i32_0 = arith.constant 0 : i32
    return %c0_i32, %arg0 : i32, i32
  }
  func.func @transform_2(%arg0: i32) -> (i32, i32) {
    %c0_i32 = arith.constant 0 : i32
    %c0_i32_0 = arith.constant 0 : i32
    %c0_i32_1 = arith.constant 0 : i32
    return %c0_i32, %c0_i32_0 : i32, i32
  }
  func.func @transform_3(%arg0: i32) -> (i32, i32, i32) {
    %c0_i32 = arith.constant 0 : i32
    %c0_i32_0 = arith.constant 0 : i32
    %c0_i32_1 = arith.constant 0 : i32
    return %c0_i32, %c0_i32_0, %arg0 : i32, i32, i32
  }
}

</mosaic_0001>

<bundles_post_ra>
// kernel: tpu_custom_call.1
= control target key start
LH: loop header
LB: loop body
LE: loop exit
PB: predicated region body
PF: predicated region fallthrough
CT: control target
= control target key end

     0   :  { %8 = vsyncpa [#allocation3], 0  ;;  %s888_s0 = inlined_call_operand.hbm [shape: f32[4,256], index: 0, kind: input, shape index: {}]   ;;  %s889_s1 = inlined_call_operand.hbm [shape: f32[4,256], index: 1, kind: input, shape index: {}]   ;;  %s890_s2 = inlined_call_operand.hbm [shape: f32[104,128], index: 2, kind: input, shape index: {}]   ;;  %s891_s3 = inlined_call_operand.hbm [shape: f32[2,4,256], index: 3, kind: output, shape index: {}]  }
   0x1   :  { %9 = vsyncpa [#allocation6], 0 }
   0x2   :  { %10 = vsyncpa [#allocation4], 0  ;;  %s755_s12 = smov [#allocation5]   ;;  %s756_s14 = smov [#allocation2]  }
   0x3   :  { %s27_s13 = sshll.u32 %s755_s12, 4  ;;  %s17_s15 = sshll.u32 %s756_s14, 4  ;;  %s28_s13 = int_to_ptr.vmem [resolvable:$true] %s27_s13  ;;  %s18_s15 = int_to_ptr.vmem [resolvable:$true] %s17_s15 }
   0x4   :  { %s661_s18 = scalar_lea.hbm %s889_s1, 128 }
   0x5   :  { %p662_p0 = scmp.ne.s32.totalorder %s889_s1, %s661_s18  ;;  %p665_p1 = scmp.lt.u32.totalorder %s661_s18, %s889_s1 }
   0x7   :  { %p667_p2 = pnand %p665_p1, %p662_p0 }
   0x9   :  { %670 = shalt.err (!%p667_p2)
}
   0xa   :  { %s671_s23 = scalar_lea.vmem %s28_s13, 128  ;;  %p676_p4 = scmp.lt.s32.totalorder %s28_s13, %s28_s13 }
   0xb   :  { %p672_p3 = scmp.ne.s32.totalorder %s28_s13, %s671_s23  ;;  %p677_p5 = scmp.lt.s32.totalorder %s671_s23, %s671_s23 }
   0xd   :  { %p678_p6 = por %p677_p5, %p676_p4 }
   0xf   :  { %p679_p7 = pnand %p678_p6, %p672_p3 }
  0x11   :  { %682 = shalt.err (!%p679_p7)
}
  0x12   :  { %30 = dma.hbm_to_vmem [thread:$0]  %s889_s1, 128, %s28_s13, [#allocation6]  }
  0x13   :  { %s683_s28 = scalar_lea.hbm %s888_s0, 128 }
  0x14   :  { %p684_p8 = scmp.ne.s32.totalorder %s888_s0, %s683_s28  ;;  %p687_p9 = scmp.lt.u32.totalorder %s683_s28, %s888_s0 }
  0x16   :  { %p689_p10 = pnand %p687_p9, %p684_p8 }
  0x18   :  { %692 = shalt.err (!%p689_p10)
}
  0x19   :  { %s693_s6 = scalar_lea.vmem %s18_s15, 128  ;;  %p698_p12 = scmp.lt.s32.totalorder %s18_s15, %s18_s15 }
  0x1a   :  { %p694_p11 = scmp.ne.s32.totalorder %s18_s15, %s693_s6  ;;  %p699_p13 = scmp.lt.s32.totalorder %s693_s6, %s693_s6 }
  0x1c   :  { %p700_p0 = por %p699_p13, %p698_p12 }
  0x1e   :  { %p701_p1 = pnand %p700_p0, %p694_p11 }
  0x20   :  { %704 = shalt.err (!%p701_p1)
}
  0x21   :  { %20 = dma.hbm_to_vmem [thread:$0]  %s888_s0, 128, %s18_s15, [#allocation3]  }
  0x22   :  { %s757_s8 = smov [#allocation7]   ;;  %s705_s12 = scalar_lea.hbm %s890_s2, 1664 }
  0x23   :  { %s36_s9 = sshll.u32 %s757_s8, 4  ;;  %p706_p2 = scmp.ne.s32.totalorder %s890_s2, %s705_s12  ;;  %s37_s9 = int_to_ptr.vmem [resolvable:$true] %s36_s9 }
  0x24   :  { %p709_p3 = scmp.lt.u32.totalorder %s705_s12, %s890_s2 }
  0x26   :  { %p711_p4 = pnand %p709_p3, %p706_p2 }
  0x28   :  { %714 = shalt.err (!%p711_p4)
}
  0x29   :  { %s715_s18 = scalar_lea.vmem %s37_s9, 1664  ;;  %p720_p6 = scmp.lt.s32.totalorder %s37_s9, %s37_s9 }
  0x2a   :  { %p716_p5 = scmp.ne.s32.totalorder %s37_s9, %s715_s18  ;;  %p721_p7 = scmp.lt.s32.totalorder %s715_s18, %s715_s18 }
  0x2c   :  { %p722_p8 = por %p721_p7, %p720_p6 }
  0x2e   :  { %p723_p9 = pnand %p722_p8, %p716_p5 }
  0x30   :  { %726 = shalt.err (!%p723_p9)
}
  0x31   :  { %s758_s0 = smov 128   ;;  %s759_s15 = smov 8  }
  0x32   :  { %42 = dma.hbm_to_vmem [thread:$0]  %s890_s2, 1664, %s37_s9, [#allocation6], %s758_s0, %s758_s0, %s759_s15  }
  0x33   :  { %749 = dma.done.wait [#allocation3], 128  }
  0x34   :  { %750 = vsyncadd [#allocation3], 4294967168 }
  0x35   :  { %751 = dma.done.wait [#allocation6], 1792  }
  0x36   :  { %752 = vsyncadd [#allocation6], 4294965504  ;;  %v760_v0 = vmov 0.0   ;;  %v761_v1 = vmov 4   ;;  %v52_v2 = vld [vmem:[#allocation2] sm:$0xff]  ;;  %vm89_vm0 = vcmask 1043456  }
  0x37   :  { %158 = vmatprep.mubr.f32.mxu0 %v760_v0  ;;  %170 = vmatprep.mubr.f32.mxu1 %v760_v0  ;;  %v829_v3 = vld [vmem:[#allocation7] sm:$0xff]  ;;  %v831_v4 = vld [vmem:[#allocation7 + $0x10] sm:$0xff]  ;;  %v79_v5 = vcombine.high %v52_v2, %v52_v2  ;;  %vm80_vm1 = vcmask 31744   ;;  %v839_v6 = vld [vmem:[#allocation7 + $0x8] sm:$0xff]  ;;  %v762_v8 = vmov 5   ;;  %vm219_vm2 = vcmask 261120  }
  0x38   :  { %648 = vset.pattern.permute.xlu0 %v761_v1  ;;  %649 = vset.pattern.permute.xlu1 %v761_v1  ;;  %v841_v7 = vld [vmem:[#allocation7 + $0x18] sm:$0xff]  ;;  %v191_v41 = vld [vmem:[#allocation7 + $0x20] sm:$0xff]  ;;  %v192_v42 = vld [vmem:[#allocation7 + $0x28] sm:$0xff]  ;;  %v763_v45 = vmov 6   ;;  %s767_s2 = smov [#allocation8]  }
  0x39   :  { %60 = vperm.xlu0 %648, %v829_v3   ;;  %70 = vperm.xlu1 %649, %v831_v4   ;;  %v193_v43 = vld [vmem:[#allocation7 + $0x30] sm:$0xff]  ;;  %v194_v44 = vld [vmem:[#allocation7 + $0x38] sm:$0xff]  ;;  %s580_s21 = sshll.u32 %s767_s2, 4  ;;  %s581_s21 = int_to_ptr.vmem [resolvable:$true] %s580_s21 }
  0x3a   :  { %593 = vmatprep.subr.msk.mxu0 %vm89_vm0, %v79_v5  ;;  %633 = vmatprep.subr.msk.mxu1 %vm89_vm0, %v79_v5  ;;  %s727_s22 = scalar_lea.vmem %s581_s21, 256  ;;  %p732_p11 = scmp.lt.s32.totalorder %s581_s21, %s581_s21 }
  0x3b   :  { %594 = vmatpush1.msk.msra.mxu0 %vm89_vm0, %v52_v2  ;;  %634 = vmatpush1.msk.msra.mxu1 %vm89_vm0, %v52_v2  ;;  %p728_p10 = scmp.ne.s32.totalorder %s581_s21, %s727_s22  ;;  %p733_p12 = scmp.lt.s32.totalorder %s727_s22, %s727_s22 }
  0x3c   :  { %595 = vmatmul.mubr.msk.f32.vlgmr.msra.gmra.mrb[0].mxu0 %vm80_vm1, %v829_v3  ;;  %597 = vmatmul.mubr.msk.f32.vlgmr.msra.gmra.mrb[0].mxu1 %vm80_vm1, %v831_v4 }
  0x3d   :  { %164 = vmatprep.mubr.f32.mxu0 %v760_v0  ;;  %176 = vmatprep.mubr.f32.mxu1 %v760_v0  ;;  %p734_p13 = por %p733_p12, %p732_p11 }
  0x3e   :  { %65 = vperm.xlu0 %648, %v839_v6   ;;  %75 = vperm.xlu1 %649, %v841_v7  }
  0x3f   :  { %p735_p0 = pnand %p734_p13, %p728_p10 }
  0x40   :  { %596 = vmatmul.mubr.msk.f32.gmra.mrb[2].mxu0 %vm80_vm1, %v839_v6  ;;  %598 = vmatmul.mubr.msk.f32.gmra.mrb[2].mxu1 %vm80_vm1, %v841_v7 }
  0x41   :  { %296 = vmatprep.mubr.f32.mxu1 %v760_v0  ;;  %425 = vmatprep.mubr.f32.mxu0 %v760_v0 }
  0x42   :  { %650 = vset.pattern.permute.xlu0 %v762_v8  ;;  %651 = vset.pattern.permute.xlu1 %v762_v8 }
  0x43   :  { %201 = vperm.xlu0 %650, %v829_v3   ;;  %206 = vperm.xlu1 %651, %v839_v6  }
  0x47   :  { %211 = vperm.xlu1 %651, %v831_v4   ;;  %216 = vperm.xlu0 %650, %v841_v7  }
  0x4b   :  { %652 = vset.pattern.permute.xlu1 %v763_v45  ;;  %653 = vset.pattern.permute.xlu0 %v763_v45 }
  0x4c   :  { %334 = vperm.xlu1 %652, %v829_v3   ;;  %338 = vperm.xlu0 %653, %v839_v6  }
  0x50   :  { %342 = vperm.xlu1 %652, %v831_v4  }
  0x54   :  { %346 = vperm.xlu1 %652, %v841_v7  }
  0xb8   :  { %v71_v9 = vpop.permute.xlu1 %70  ;;  %v61_v10 = vpop.permute.xlu0 %60 }
  0xbd   :  { %v76_v17 = vpop.permute.xlu1 %75  ;;  %v66_v19 = vpop.permute.xlu0 %65 }
  0xc2   :  { %v202_v46 = vpop.permute.xlu0 %201  ;;  %v207_v49 = vpop.permute.xlu1 %206 }
  0xc6   :  { %v212_v60 = vpop.permute.xlu1 %211  ;;  %v217_v3 = vpop.permute.xlu0 %216 }
 0x10f   :  { %v160_v11 = vpop.f32.mrb[0].mxu0  ;;  %v172_v12 = vpop.f32.mrb[0].mxu1 }
 0x110   :  { %v162_v13 = vpop.f32.mrb[1].mxu0  ;;  %v173_v14 = vadd.f32 %v172_v12, %v71_v9  ;;  %v174_v15 = vpop.f32.mrb[1].mxu1  ;;  %v161_v18 = vadd.f32 %v160_v11, %v61_v10 }
 0x111   :  { %v175_v16 = vadd.f32 %v174_v15, %v71_v9  ;;  %v163_v20 = vadd.f32 %v162_v13, %v61_v10  ;;  %v329_v15 = vld [vmem:[#allocation7 + $0x40] sm:$0xff] }
 0x112   :  { %v187_v23 = vmax.f32 %v173_v14, 0.0  ;;  %v183_v31 = vmax.f32 %v161_v18, 0.0  ;;  %v332_v18 = vld [vmem:[#allocation7 + $0x58] sm:$0xff] }
 0x113   :  { %v166_v21 = vpop.f32.mrb[2].mxu0  ;;  %v178_v22 = vpop.f32.mrb[2].mxu1  ;;  %v188_v28 = vmax.f32 %v175_v16, 0.0  ;;  %v184_v34 = vmax.f32 %v163_v20, 0.0  ;;  %v330_v16 = vld [vmem:[#allocation7 + $0x48] sm:$0xff] }
 0x114   :  { %v167_v24 = vadd.f32 %v166_v21, %v66_v19  ;;  %v179_v25 = vadd.f32 %v178_v22, %v76_v17  ;;  %v168_v26 = vpop.f32.mrb[3].mxu0  ;;  %v180_v27 = vpop.f32.mrb[3].mxu1  ;;  %v764_v21 = vmov 33   ;;  %v765_v22 = vmov 32  }
 0x115   :  { %v169_v29 = vadd.f32 %v168_v26, %v66_v19  ;;  %v181_v30 = vadd.f32 %v180_v27, %v76_v17  ;;  %v331_v17 = vld [vmem:[#allocation7 + $0x50] sm:$0xff]  ;;  %v458_v19 = vld [vmem:[#allocation7 + $0x60] sm:$0xf]  ;;  %655 = vset.pattern.permute.xlu1 %v764_v21  ;;  %654 = vset.pattern.permute.xlu0 %v765_v22 }
 0x116   :  { %v185_v32 = vmax.f32 %v167_v24, 0.0  ;;  %v189_v33 = vmax.f32 %v179_v25, 0.0  ;;  %v537_v20 = vmax.f32 %v458_v19, -13.815511  ;;  %461 = vperm.xlu0 %654, %v458_v19   ;;  %v335_v25 = vpop.permute.xlu1 %334 }
 0x117   :  { %v186_v35 = vmax.f32 %v169_v29, 0.0  ;;  %v190_v36 = vmax.f32 %v181_v30, 0.0 }
 0x118   :  { %v611_v37 = vpack.c.bf16 %v185_v32, %v183_v31  ;;  %v615_v38 = vpack.c.bf16 %v189_v33, %v187_v23  ;;  %v538_v23 = vmul.f32 1.442695, %v537_v20 }
 0x119   :  { %v609_v39 = vpack.c.bf16 %v186_v35, %v184_v34  ;;  %v613_v40 = vpack.c.bf16 %v190_v36, %v188_v28 }
 0x11a   :  { %659 = vpow2.f32 %v538_v23  ;;  %656 = vset.pattern.permute.xlu0 %v764_v21  ;;  %v343_v33 = vpop.permute.xlu1 %342 }
 0x11b   :  { %610 = vmatprep.subr.bf16.mxu1 %v609_v39 }
 0x11c   :  { %612 = vmatpush1.bf16.msra.mxu1 %v611_v37 }
 0x11d   :  { %614 = vmatprep.subr.bf16.mxu1 %v613_v40 }
 0x120   :  { %616 = vmatpush1.bf16.msra.mxu1 %v615_v38 }
 0x123   :  { %599 = vmatmul.mubr.msk.f32.vlgmr.msra.gmra.mrb[4].mxu1 %vm219_vm2, %v191_v41 }
 0x124   :  { %302 = vmatprep.mubr.f32.mxu1 %v760_v0  ;;  %v660_v24 = vpop.eup %659 }
 0x125   :  { %542 = vperm.xlu1 %655, %v660_v24  }
 0x127   :  { %600 = vmatmul.mubr.msk.f32.gmra.mrb[6].mxu1 %vm219_vm2, %v192_v42 }
 0x128   :  { %308 = vmatprep.mubr.f32.mxu1 %v760_v0 }
 0x129   :  { %561 = vperm.xlu1 %655, %v537_v20  }
 0x12b   :  { %601 = vmatmul.mubr.msk.f32.gmra.mrb[8].mxu1 %vm219_vm2, %v193_v43 }
 0x12c   :  { %314 = vmatprep.mubr.f32.mxu1 %v760_v0 }
 0x12f   :  { %602 = vmatmul.mubr.msk.f32.gmra.mrb[10].mxu1 %vm219_vm2, %v194_v44  ;;  %v347_v44 = vpop.permute.xlu1 %346 }
 0x130   :  { %530 = vmatprep.mubr.f32.mxu1 %v760_v0 }
 0x1f6   :  { %v298_v47 = vpop.f32.mrb[4].mxu1 }
 0x1f7   :  { %v300_v48 = vpop.f32.mrb[5].mxu1  ;;  %v299_v50 = vadd.f32 %v298_v47, %v202_v46 }
 0x1f8   :  { %v301_v51 = vadd.f32 %v300_v48, %v202_v46 }
 0x1f9   :  { %v321_v56 = vmax.f32 %v299_v50, 0.0 }
 0x1fa   :  { %v304_v52 = vpop.f32.mrb[6].mxu1  ;;  %v322_v58 = vmax.f32 %v301_v51, 0.0 }
 0x1fb   :  { %v305_v53 = vadd.f32 %v304_v52, %v207_v49  ;;  %v306_v54 = vpop.f32.mrb[7].mxu1 }
 0x1fc   :  { %v307_v55 = vadd.f32 %v306_v54, %v207_v49 }
 0x1fd   :  { %v323_v57 = vmax.f32 %v305_v53, 0.0 }
 0x1fe   :  { %v324_v59 = vmax.f32 %v307_v55, 0.0  ;;  %v310_v61 = vpop.f32.mrb[8].mxu1 }
 0x1ff   :  { %v619_v62 = vpack.c.bf16 %v323_v57, %v321_v56  ;;  %v312_v63 = vpop.f32.mrb[9].mxu1  ;;  %v311_v2 = vadd.f32 %v310_v61, %v212_v60  ;;  %v543_v56 = vpop.permute.xlu1 %542  ;;  %v766_v57 = vmov 839922192  }
 0x200   :  { %v617_v1 = vpack.c.bf16 %v324_v59, %v322_v58  ;;  %v313_v4 = vadd.f32 %v312_v63, %v212_v60  ;;  %v564_v58 = vunpack.c.l.s4 %v766_v57  ;;  %v566_v59 = vlaneseq  ;;  %v53_v60 = vld [vmem:[#allocation5] sm:$0xff] }
 0x201   :  { %v325_v9 = vmax.f32 %v311_v2, 0.0 }
 0x202   :  { %v316_v5 = vpop.f32.mrb[10].mxu1  ;;  %618 = vmatprep.subr.bf16.mxu0 %v617_v1  ;;  %v326_v11 = vmax.f32 %v313_v4, 0.0  ;;  %v565_v61 = vunpack.c.0.s8 %v564_v58  ;;  %v557_v1 = vmul.f32 %v53_v60, %v53_v60 }
 0x203   :  { %v317_v6 = vadd.f32 %v316_v5, %v217_v3  ;;  %v318_v7 = vpop.f32.mrb[11].mxu1  ;;  %620 = vmatpush1.bf16.msra.mxu0 %v619_v62  ;;  %v567_v62 = vshrl.u32 %v566_v59, 7  ;;  %v562_v2 = vpop.permute.xlu1 %561 }
 0x204   :  { %v319_v8 = vadd.f32 %v318_v7, %v217_v3  ;;  %v558_v3 = vmul.f32 -0.5, %v557_v1  ;;  %v546_v7 = vcombine.high %v53_v60, %v53_v60 }
 0x205   :  { %v327_v10 = vmax.f32 %v317_v6, 0.0  ;;  %v568_v63 = vsub.s32 %v565_v61, %v567_v62 }
 0x206   :  { %v328_v12 = vmax.f32 %v319_v8, 0.0 }
 0x207   :  { %v623_v13 = vpack.c.bf16 %v327_v10, %v325_v9  ;;  %v569_v4 = vrot.slane %v562_v2, %v568_v63  ;;  %v548_v10 = vmul.f32 %v543_v56, %v53_v60 }
 0x208   :  { %v621_v14 = vpack.c.bf16 %v328_v12, %v326_v11 }
 0x209   :  { %v571_v5 = vsub.f32 %v558_v3, %v569_v4 }
 0x20a   :  { %622 = vmatprep.subr.bf16.mxu0 %v621_v14 }
 0x20b   :  { %624 = vmatpush1.bf16.msra.mxu0 %v623_v13  ;;  %v608_v6 = vadd.f32 -0.9189385, %v571_v5  ;;  %v549_v13 = vmul.f32 %v546_v7, %v543_v56 }
 0x20d   :  { %574 = vst [vmem:[#allocation8 + $0x8] sm:$0xff] %v608_v6 }
 0x20e   :  { %603 = vmatmul.mubr.msk.f32.vlgmr.msra.gmra.mrb[4].mxu0 %vm219_vm2, %v329_v15 }
 0x20f   :  { %431 = vmatprep.mubr.f32.mxu0 %v760_v0 }
 0x212   :  { %604 = vmatmul.mubr.msk.f32.gmra.mrb[6].mxu0 %vm219_vm2, %v330_v16 }
 0x213   :  { %437 = vmatprep.mubr.f32.mxu0 %v760_v0 }
 0x216   :  { %605 = vmatmul.mubr.msk.f32.gmra.mrb[8].mxu0 %vm219_vm2, %v331_v17 }
 0x217   :  { %443 = vmatprep.mubr.f32.mxu0 %v760_v0  ;;  %v339_v0 = vpop.permute.xlu0 %338 }
 0x21a   :  { %606 = vmatmul.mubr.msk.f32.gmra.mrb[10].mxu0 %vm219_vm2, %v332_v18 }
 0x21b   :  { %v462_v8 = vpop.permute.xlu0 %461 }
 0x2e1   :  { %v427_v26 = vpop.f32.mrb[4].mxu0 }
 0x2e2   :  { %v429_v27 = vpop.f32.mrb[5].mxu0  ;;  %v428_v28 = vadd.f32 %v427_v26, %v335_v25 }
 0x2e3   :  { %v430_v29 = vadd.f32 %v429_v27, %v335_v25 }
 0x2e4   :  { %v450_v35 = vmax.f32 %v428_v28, 0.0 }
 0x2e5   :  { %v433_v30 = vpop.f32.mrb[6].mxu0  ;;  %v451_v37 = vmax.f32 %v430_v29, 0.0 }
 0x2e6   :  { %v434_v31 = vadd.f32 %v433_v30, %v339_v0  ;;  %v435_v32 = vpop.f32.mrb[7].mxu0 }
 0x2e7   :  { %v436_v34 = vadd.f32 %v435_v32, %v339_v0 }
 0x2e8   :  { %v452_v36 = vmax.f32 %v434_v31, 0.0 }
 0x2e9   :  { %v453_v38 = vmax.f32 %v436_v34, 0.0  ;;  %v439_v39 = vpop.f32.mrb[8].mxu0 }
 0x2ea   :  { %v627_v40 = vpack.c.bf16 %v452_v36, %v450_v35  ;;  %v441_v41 = vpop.f32.mrb[9].mxu0  ;;  %v440_v43 = vadd.f32 %v439_v39, %v343_v33 }
 0x2eb   :  { %v625_v42 = vpack.c.bf16 %v453_v38, %v451_v37  ;;  %v442_v45 = vadd.f32 %v441_v41, %v343_v33 }
 0x2ec   :  { %v454_v50 = vmax.f32 %v440_v43, 0.0 }
 0x2ed   :  { %v445_v46 = vpop.f32.mrb[10].mxu0  ;;  %626 = vmatprep.subr.bf16.mxu1 %v625_v42  ;;  %v455_v52 = vmax.f32 %v442_v45, 0.0 }
 0x2ee   :  { %v446_v47 = vadd.f32 %v445_v46, %v347_v44  ;;  %v447_v48 = vpop.f32.mrb[11].mxu0  ;;  %628 = vmatpush1.bf16.msra.mxu1 %v627_v40 }
 0x2ef   :  { %v448_v49 = vadd.f32 %v447_v48, %v347_v44 }
 0x2f0   :  { %v456_v51 = vmax.f32 %v446_v47, 0.0 }
 0x2f1   :  { %v457_v53 = vmax.f32 %v448_v49, 0.0 }
 0x2f2   :  { %v631_v54 = vpack.c.bf16 %v456_v51, %v454_v50 }
 0x2f3   :  { %v629_v55 = vpack.c.bf16 %v457_v53, %v455_v52 }
 0x2f5   :  { %630 = vmatprep.subr.bf16.mxu1 %v629_v55 }
 0x2f6   :  { %632 = vmatpush1.bf16.msra.mxu1 %v631_v54 }
 0x2f9   :  { %607 = vmatmul.mubr.msk.f32.vlgmr.msra.gmra.mrb[12].mxu1 %vm219_vm2, %v458_v19 }
 0x3cc   :  { %v532_v9 = vpop.f32.mrb[12].mxu1 }
 0x3cd   :  { %v533_v11 = vadd.f32 %v532_v9, %v462_v8  ;;  %v534_v12 = vpop.f32.mrb[13].mxu1 }
 0x3ce   :  { %v535_v14 = vadd.f32 %v534_v12, %v462_v8 }
 0x3cf   :  { %v550_v15 = vadd.f32 %v548_v10, %v533_v11 }
 0x3d0   :  { %v551_v16 = vadd.f32 %v549_v13, %v535_v14 }
 0x3d2   :  { %v554_v17 = vcombine.low %v550_v15, %v551_v16 }
 0x3d4   :  { %556 = vst [vmem:[#allocation8] sm:$0xff] %v554_v17 }
 0x3d5   :  { %738 = shalt.err (!%p735_p0)
}
 0x3d6   :  { %s739_s25 = scalar_lea.hbm %s891_s3, 256 }
 0x3d7   :  { %p740_p1 = scmp.ne.s32.totalorder %s891_s3, %s739_s25  ;;  %p743_p2 = scmp.lt.u32.totalorder %s739_s25, %s891_s3 }
 0x3d9   :  { %p745_p3 = pnand %p743_p2, %p740_p1 }
 0x3db   :  { %748 = shalt.err (!%p745_p3)
}
 0x3dc   :  { %586 = dma.vmem_to_hbm [thread:$0]  %s581_s21, 256, %s891_s3, [#allocation4], %s758_s0, %s758_s0, %s759_s15  }
 0x3dd   :  { %753 = dma.done.wait [#allocation4], 256  }
 0x3de   :  { %754 = vsyncadd [#allocation4], 4294967040 }
 0x3df   :  { %590 = vsyncpa [#allocation3], 1 }
 0x3e0   :  { %591 = vsyncpa [#allocation6], 1 }
 0x3e1   :  { %592 = vsyncpa [#allocation4], 1 }

</bundles_post_ra>
